<compile_context>
chip_gen: v7x
topology: tpu7x:2x2x1
jax: 0.10.0
libtpu: 0.0.40
codegen_flags: <defaults>
</compile_context>

<pallas_src>
import jax
import jax.numpy as jnp
from jax.experimental import pallas as pl
from jax.experimental.pallas import tpu as pltpu

NUM_FEATURES = 2
OUT_FEATURES = 28 * 28  # 784
TB_MAX = 1024           # batch-tile rows (double-buffered tile fits default scoped VMEM)


def _decoder_kernel(x_ref, w_ref, b_ref, o_ref):
    # x_ref: (TB, F)  w_ref: (F, 784)  b_ref: (1, 784)  o_ref: (TB, 784)
    y = jnp.dot(x_ref[...], w_ref[...], preferred_element_type=jnp.float32)
    y = y + b_ref[...]                                           # bias broadcast over rows
    o_ref[...] = pl.reciprocal(1.0 + jnp.exp(-y), approx=False)  # sigmoid (exp + rcp on EUP)


def simple_decoder(x, w, b):
    """x: (B, num_features) f32; w: (num_features, 784) f32; b: (784,) f32
    returns: (B, 1, 28, 28) f32 (NCHW, matching the PyTorch module)."""
    B, F = x.shape
    b2d = b.reshape(1, OUT_FEATURES)

    # TB = min(TB_MAX, B) always satisfies the (8,128) block constraint:
    # either TB == B (equals the full dim) or TB == TB_MAX (a multiple of 8).
    TB = min(TB_MAX, B)
    grid = (pl.cdiv(B, TB),)

    out = pl.pallas_call(
        _decoder_kernel,
        out_shape=jax.ShapeDtypeStruct((B, OUT_FEATURES), jnp.float32),
        grid_spec=pltpu.PrefetchScalarGridSpec(
            num_scalar_prefetch=0,
            grid=grid,
            in_specs=[
                pl.BlockSpec((TB, F), lambda i: (i, 0)),              # batch-tiled x
                pl.BlockSpec((F, OUT_FEATURES), lambda i: (0, 0)),    # W resident in VMEM
                pl.BlockSpec((1, OUT_FEATURES), lambda i: (0, 0)),    # b resident in VMEM
            ],
            out_specs=pl.BlockSpec((TB, OUT_FEATURES), lambda i: (i, 0)),
        ),
        compiler_params=pltpu.CompilerParams(
            dimension_semantics=("parallel",)),   # megacore sharding on v7x
    )(x, w, b2d)

    # Glue: reshape to NCHW (-1, 1, 28, 28), same as the PyTorch module.
    return out.reshape(-1, 1, 28, 28)


def _reference(x, w, b):
    y = x @ w + b
    y = jax.nn.sigmoid(y)
    return y.reshape(-1, 1, 28, 28)


if __name__ == "__main__":
    key = jax.random.PRNGKey(0)
    kx, kw, kb = jax.random.split(key, 3)

    # Deterministic parameter init (mimics nn.Linear uniform(-1/sqrt(in), 1/sqrt(in))).
    bound = 1.0 / (NUM_FEATURES ** 0.5)
    w = jax.random.uniform(kw, (NUM_FEATURES, OUT_FEATURES),
                           minval=-bound, maxval=bound, dtype=jnp.float32)
    b = jax.random.uniform(kb, (OUT_FEATURES,),
                           minval=-bound, maxval=bound, dtype=jnp.float32)

    # Small test case matching the module's expected usage (batch=2).
    batch = 2
    x = jax.random.normal(kx, (batch, NUM_FEATURES), dtype=jnp.float32)
    out = jax.block_until_ready(simple_decoder(x, w, b))
    ref = _reference(x, w, b)
    assert out.shape == (batch, 1, 28, 28), out.shape
    assert jnp.allclose(out, ref, atol=1e-5, rtol=1e-5), "mismatch vs reference (B=2)"

    # Larger batch to exercise the tiled/pipelined path (multiple grid steps,
    # including a partial boundary tile).
    big_batch = 2500
    xb = jax.random.normal(kx, (big_batch, NUM_FEATURES), dtype=jnp.float32)
    outb = jax.block_until_ready(simple_decoder(xb, w, b))
    refb = _reference(xb, w, b)
    assert outb.shape == (big_batch, 1, 28, 28), outb.shape
    assert jnp.allclose(outb, refb, atol=1e-5, rtol=1e-5), "mismatch vs reference (B=2500)"

    print("KERNEL_OK")
</pallas_src>

<mosaic_0001>
module attributes {stable_mosaic.version = 11 : i64} {
  func.func @_decoder_kernel(%arg0: i32, %arg1: memref<2x2xf32, #tpu.memory_space<vmem>>, %arg2: memref<2x784xf32, #tpu.memory_space<vmem>>, %arg3: memref<1x784xf32, #tpu.memory_space<vmem>>, %arg4: memref<2x784xf32, #tpu.memory_space<vmem>>) attributes {dimension_semantics = [#tpu.dimension_semantics<parallel>], iteration_bounds = array<i64: 1>, scalar_prefetch = 0 : i64, scratch_operands = 0 : i64, tpu.core_type = #tpu.core_type<tc>, window_params = [{transform_indices = @transform_0, window_bounds = array<i64: 2, 2>}, {pipeline_mode = #tpu.pipeline_mode<synchronous>, transform_indices = @transform_1, window_bounds = array<i64: 2, 784>}, {pipeline_mode = #tpu.pipeline_mode<synchronous>, transform_indices = @transform_2, window_bounds = array<i64: 1, 784>}, {transform_indices = @transform_3, window_bounds = array<i64: 2, 784>}]} {
    %c0 = arith.constant 0 : index
    %c0_0 = arith.constant 0 : index
    %0 = vector.load %arg1[%c0, %c0_0] : memref<2x2xf32, #tpu.memory_space<vmem>>, vector<2x2xf32>
    %c0_1 = arith.constant 0 : index
    %c0_2 = arith.constant 0 : index
    %1 = vector.load %arg2[%c0_1, %c0_2] : memref<2x784xf32, #tpu.memory_space<vmem>>, vector<2x784xf32>
    %cst = arith.constant dense<0.000000e+00> : vector<2x784xf32>
    %2 = tpu.matmul %0, %1, %cst {dimension_numbers = #tpu.dot_dimension_numbers<[1], [0], [0], [1], [0, 0, 1, 1], [], []>} : vector<2x2xf32>, vector<2x784xf32>, vector<2x784xf32> -> vector<2x784xf32>
    %c0_3 = arith.constant 0 : index
    %c0_4 = arith.constant 0 : index
    %3 = vector.load %arg3[%c0_3, %c0_4] : memref<1x784xf32, #tpu.memory_space<vmem>>, vector<1x784xf32>
    %4 = vector.broadcast %3 : vector<1x784xf32> to vector<2x784xf32>
    %5 = arith.addf %2, %4 : vector<2x784xf32>
    %cst_5 = arith.constant 0.000000e+00 : f32
    %6 = vector.broadcast %cst_5 : f32 to vector<2x784xf32>
    %7 = arith.subf %6, %5 : vector<2x784xf32>
    %8 = math.exp %7 : vector<2x784xf32>
    %cst_6 = arith.constant 1.000000e+00 : f32
    %9 = vector.broadcast %cst_6 : f32 to vector<2x784xf32>
    %10 = arith.addf %9, %8 : vector<2x784xf32>
    %11 = tpu.reciprocal %10 : vector<2x784xf32> -> vector<2x784xf32>
    %c0_7 = arith.constant 0 : index
    %c0_8 = arith.constant 0 : index
    %12 = vector.load %arg4[%c0_7, %c0_8] : memref<2x784xf32, #tpu.memory_space<vmem>>, vector<2x784xf32>
    tpu.vector_store %arg4[%c0_7, %c0_8], %11 {strides = array<i32>} : memref<2x784xf32, #tpu.memory_space<vmem>>, vector<2x784xf32>,
    return
  }
  func.func @transform_0(%arg0: i32) -> (i32, i32) {
    %c0_i32 = arith.constant 0 : i32
    %c0_i32_0 = arith.constant 0 : i32
    return %arg0, %c0_i32 : i32, i32
  }
  func.func @transform_1(%arg0: i32) -> (i32, i32) {
    %c0_i32 = arith.constant 0 : i32
    %c0_i32_0 = arith.constant 0 : i32
    %c0_i32_1 = arith.constant 0 : i32
    return %c0_i32, %c0_i32_0 : i32, i32
  }
  func.func @transform_2(%arg0: i32) -> (i32, i32) {
    %c0_i32 = arith.constant 0 : i32
    %c0_i32_0 = arith.constant 0 : i32
    %c0_i32_1 = arith.constant 0 : i32
    return %c0_i32, %c0_i32_0 : i32, i32
  }
  func.func @transform_3(%arg0: i32) -> (i32, i32) {
    %c0_i32 = arith.constant 0 : i32
    %c0_i32_0 = arith.constant 0 : i32
    return %arg0, %c0_i32 : i32, i32
  }
}

</mosaic_0001>

<bundles_post_ra>
// kernel: tpu_custom_call.1
= control target key start
LH: loop header
LB: loop body
LE: loop exit
PB: predicated region body
PF: predicated region fallthrough
CT: control target
= control target key end

     0   :  { %8 = vsyncpa [#allocation3], 0  ;;  %s728_s0 = inlined_call_operand.hbm [shape: f32[2,2], index: 0, kind: input, shape index: {}]   ;;  %s729_s1 = inlined_call_operand.hbm [shape: f32[2,784], index: 1, kind: input, shape index: {}]   ;;  %s730_s2 = inlined_call_operand.vmem [shape: f32[1,784], index: 2, kind: input, shape index: {}]   ;;  %s731_s3 = inlined_call_operand.hbm [shape: f32[2,784], index: 3, kind: output, shape index: {}]  }
   0x1   :  { %9 = vsyncpa [#allocation6], 0 }
   0x2   :  { %10 = vsyncpa [#allocation4], 0  ;;  %s641_s12 = smov [#allocation2]   ;;  %s642_s14 = smov [#allocation5]  }
   0x3   :  { %s17_s13 = sshll.u32 %s641_s12, 4  ;;  %s27_s15 = sshll.u32 %s642_s14, 4  ;;  %s18_s13 = int_to_ptr.vmem [resolvable:$true] %s17_s13  ;;  %s28_s15 = int_to_ptr.vmem [resolvable:$true] %s27_s15 }
   0x4   :  { %s569_s18 = scalar_lea.hbm %s728_s0, 32 }
   0x5   :  { %p570_p0 = scmp.ne.s32.totalorder %s728_s0, %s569_s18  ;;  %p573_p1 = scmp.lt.u32.totalorder %s569_s18, %s728_s0 }
   0x7   :  { %p575_p2 = pnand %p573_p1, %p570_p0 }
   0x9   :  { %578 = shalt.err (!%p575_p2)
}
   0xa   :  { %s579_s23 = scalar_lea.vmem %s18_s13, 32  ;;  %p584_p4 = scmp.lt.s32.totalorder %s18_s13, %s18_s13 }
   0xb   :  { %p580_p3 = scmp.ne.s32.totalorder %s18_s13, %s579_s23  ;;  %p585_p5 = scmp.lt.s32.totalorder %s579_s23, %s579_s23 }
   0xd   :  { %p586_p6 = por %p585_p5, %p584_p4 }
   0xf   :  { %p587_p7 = pnand %p586_p6, %p580_p3 }
  0x11   :  { %590 = shalt.err (!%p587_p7)
}
  0x12   :  { %20 = dma.hbm_to_vmem [thread:$0]  %s728_s0, 32, %s18_s13, [#allocation3]  }
  0x13   :  { %s591_s28 = scalar_lea.hbm %s729_s1, 224 }
  0x14   :  { %p592_p8 = scmp.ne.s32.totalorder %s729_s1, %s591_s28  ;;  %p595_p9 = scmp.lt.u32.totalorder %s591_s28, %s729_s1 }
  0x16   :  { %p597_p10 = pnand %p595_p9, %p592_p8 }
  0x18   :  { %600 = shalt.err (!%p597_p10)
}
  0x19   :  { %s601_s6 = scalar_lea.vmem %s28_s15, 224  ;;  %p606_p12 = scmp.lt.s32.totalorder %s28_s15, %s28_s15 }
  0x1a   :  { %p602_p11 = scmp.ne.s32.totalorder %s28_s15, %s601_s6  ;;  %p607_p13 = scmp.lt.s32.totalorder %s601_s6, %s601_s6 }
  0x1c   :  { %p608_p0 = por %p607_p13, %p606_p12 }
  0x1e   :  { %p609_p1 = pnand %p608_p0, %p602_p11 }
  0x20   :  { %612 = shalt.err (!%p609_p1)
}
  0x21   :  { %30 = dma.hbm_to_vmem [thread:$0]  %s729_s1, 224, %s28_s15, [#allocation6]  }
  0x22   :  { %635 = dma.done.wait [#allocation3], 32  }
  0x23   :  { %636 = vsyncadd [#allocation3], 4294967264 }
  0x24   :  { %637 = dma.done.wait [#allocation6], 224  }
  0x25   :  { %638 = vsyncadd [#allocation6], 4294967072  ;;  %v44_v0 = vlaneseq  ;;  %v643_v1 = vmov 1983009808   ;;  %v644_v3 = vmov 0.0   ;;  %v40_v7 = vld [vmem:[#allocation5] sm:$0xff] }
  0x26   :  { %v83_v2 = vunpack.c.l.s4 %v643_v1  ;;  %197 = vmatprep.mubr.f32.mxu0 %v644_v3  ;;  %268 = vmatprep.mubr.f32.mxu1 %v644_v3  ;;  %v41_v8 = vld [vmem:[#allocation5 + $0x8] sm:$0x3f]  ;;  %v81_v10 = vcombine.high %v40_v7, %v40_v7  ;;  %vm118_vm0 = vcmask 1041408   ;;  %v39_v15 = vld [vmem:[#allocation2] sm:$0x3]  ;;  %vm114_vm1 = vcmask 15360  }
  0x27   :  { %v45_v4 = vshrl.u32 %v44_v0, 7  ;;  %v98_v14 = vcombine.high %v41_v8, %v41_v8  ;;  %vm645_vm2 = vmmov 0   ;;  %v42_v20 = vld [vmem:[%s730_s2] sm:$0x7f]  ;;  %vm494_vm3 = vcmask 1043458   ;;  %s646_s2 = smov [#allocation7]  }
  0x28   :  { %v84_v5 = vunpack.c.0.s8 %v83_v2  ;;  %vm495_vm4 = vmor %vm494_vm3, %vm118_vm0  ;;  %vm496_vm5 = vcmask 128004   ;;  %s505_s9 = sshll.u32 %s646_s2, 4  ;;  %s506_s9 = int_to_ptr.vmem [resolvable:$true] %s505_s9 }
  0x29   :  { %v46_v19 = vsub.s32 0, %v45_v4  ;;  %v50_v21 = vsub.s32 1, %v45_v4  ;;  %v54_v22 = vsub.s32 2, %v45_v4  ;;  %v58_v23 = vsub.s32 3, %v45_v4  ;;  %vm497_vm6 = vmor %vm496_vm5, %vm495_vm4  ;;  %s613_s10 = scalar_lea.vmem %s506_s9, 224  ;;  %p618_p3 = scmp.lt.s32.totalorder %s506_s9, %s506_s9 }
  0x2a   :  { %v691_v6 = vsub.s32 %v84_v5, %v45_v4  ;;  %v62_v25 = vsub.s32 4, %v45_v4  ;;  %v66_v27 = vsub.s32 5, %v45_v4  ;;  %v70_v29 = vsub.s32 6, %v45_v4  ;;  %p614_p2 = scmp.ne.s32.totalorder %s506_s9, %s613_s10  ;;  %p619_p4 = scmp.lt.s32.totalorder %s613_s10, %s613_s10 }
  0x2b   :  { %v47_v24 = vrot.slane %v42_v20, %v46_v19  ;;  %v51_v26 = vrot.slane %v42_v20, %v50_v21  ;;  %v55_v28 = vrot.slane %v42_v20, %v54_v22  ;;  %v59_v31 = vrot.slane %v42_v20, %v58_v23 }
  0x2c   :  { %v88_v9 = vrot.slane %v40_v7, %v691_v6  ;;  %v105_v11 = vrot.slane %v41_v8, %v691_v6  ;;  %v95_v13 = vrot.slane %v81_v10, %v691_v6  ;;  %v112_v18 = vrot.slane %v98_v14, %v691_v6  ;;  %p620_p5 = por %p619_p4, %p618_p3 }
  0x2d   :  { %v63_v34 = vrot.slane %v42_v20, %v62_v25  ;;  %v67_v37 = vrot.slane %v42_v20, %v66_v27  ;;  %v71_v41 = vrot.slane %v42_v20, %v70_v29 }
  0x2e   :  { %v96_v12 = vcombine.high %v88_v9, %v88_v9  ;;  %v113_v16 = vcombine.high %v105_v11, %v105_v11  ;;  %v97_v17 = vcombine.high %v95_v13, %v95_v13  ;;  %p621_p6 = pnand %p620_p5, %p614_p2 }
  0x30   :  { %515 = vmatprep.subr.msk.mxu0 %vm118_vm0, %v96_v12  ;;  %518 = vmatprep.subr.msk.mxu1 %vm118_vm0, %v97_v17 }
  0x31   :  { %516 = vmatpush1.msk.msra.mxu0 %vm118_vm0, %v88_v9  ;;  %519 = vmatpush1.msk.msra.mxu1 %vm118_vm0, %v95_v13 }
  0x32   :  { %517 = vmatmul.mubr.msk.f32.vlgmr.msra.gmra.mrb[0].mxu0 %vm114_vm1, %v39_v15  ;;  %521 = vmatprep.subr.msk.mxu0 %vm118_vm0, %v113_v16 }
  0x33   :  { %522 = vmatpush1.msk.msra.mxu0 %vm118_vm0, %v105_v11  ;;  %520 = vmatmul.mubr.msk.f32.vlgmr.msra.gmra.mrb[0].mxu1 %vm114_vm1, %v39_v15 }
  0x34   :  { %339 = vmatprep.mubr.f32.mxu0 %v644_v3  ;;  %528 = vmatprep.subr.mxu1 %v644_v3 }
  0x35   :  { %529 = vmatpush3.msk.msra.mxu1 %vm118_vm0, %v112_v18  ;;  %530 = vmatprep.mubr.msk.f32.mxu1 %vm645_vm2, %v644_v3 }
  0x36   :  { %523 = vmatmul.mubr.msk.f32.vlgmr.msra.gmra.mrb[2].mxu0 %vm114_vm1, %v39_v15 }
  0x37   :  { %531 = vmatmul.mubr.msk.f32.vlgmr.msra.gmra.mrb[2].mxu1 %vm114_vm1, %v39_v15 }
 0x105   :  { %v199_v30 = vpop.f32.mrb[0].mxu0 }
 0x106   :  { %v200_v32 = vadd.f32 %v199_v30, %v47_v24  ;;  %v201_v33 = vpop.f32.mrb[1].mxu0  ;;  %v270_v36 = vpop.f32.mrb[0].mxu1 }
 0x107   :  { %v202_v35 = vadd.f32 %v201_v33, %v51_v26  ;;  %v271_v39 = vadd.f32 %v270_v36, %v55_v28  ;;  %v272_v40 = vpop.f32.mrb[1].mxu1 }
 0x108   :  { %v416_v38 = vsub.f32 0.0, %v200_v32  ;;  %v273_v43 = vadd.f32 %v272_v40, %v59_v31 }
 0x109   :  { %v417_v42 = vsub.f32 0.0, %v202_v35  ;;  %v341_v44 = vpop.f32.mrb[2].mxu0  ;;  %v418_v46 = vsub.f32 0.0, %v271_v39 }
 0x10a   :  { %v423_v45 = vmul.f32 1.442695, %v416_v38  ;;  %v342_v47 = vadd.f32 %v341_v44, %v63_v34  ;;  %v343_v48 = vpop.f32.mrb[3].mxu0  ;;  %v419_v50 = vsub.f32 0.0, %v273_v43  ;;  %v412_v52 = vpop.f32.mrb[2].mxu1 }
 0x10b   :  { %v425_v49 = vmul.f32 1.442695, %v417_v42  ;;  %v344_v51 = vadd.f32 %v343_v48, %v67_v37  ;;  %v427_v53 = vmul.f32 1.442695, %v418_v46  ;;  %v413_v55 = vadd.f32 %v412_v52, %v71_v41  ;;  %v532_v56 = vpop.f32.mrb[3].mxu1 }
 0x10c   :  { %541 = vpow2.f32 %v423_v45  ;;  %v420_v54 = vsub.f32 0.0, %v342_v47  ;;  %v429_v57 = vmul.f32 1.442695, %v419_v50 }
 0x10d   :  { %543 = vpow2.f32 %v425_v49  ;;  %v421_v58 = vsub.f32 0.0, %v344_v51  ;;  %v422_v60 = vsub.f32 0.0, %v413_v55 }
 0x10e   :  { %545 = vpow2.f32 %v427_v53  ;;  %v431_v59 = vmul.f32 1.442695, %v420_v54 }
 0x10f   :  { %547 = vpow2.f32 %v429_v57  ;;  %v433_v61 = vmul.f32 1.442695, %v421_v58  ;;  %v435_v62 = vmul.f32 1.442695, %v422_v60 }
 0x110   :  { %549 = vpow2.f32 %v431_v59 }
 0x111   :  { %551 = vpow2.f32 %v433_v61 }
 0x112   :  { %553 = vpow2.f32 %v435_v62 }
 0x116   :  { %v542_v63 = vpop.eup %541 }
 0x117   :  { %v544_v0 = vpop.eup %543  ;;  %v437_v1 = vadd.f32 1.0, %v542_v63 }
 0x118   :  { %v546_v2 = vpop.eup %545  ;;  %v438_v3 = vadd.f32 1.0, %v544_v0 }
 0x119   :  { %v548_v4 = vpop.eup %547  ;;  %555 = vrcp.f32 %v437_v1  ;;  %v439_v5 = vadd.f32 1.0, %v546_v2 }
 0x11a   :  { %v550_v7 = vpop.eup %549  ;;  %557 = vrcp.f32 %v438_v3  ;;  %v440_v8 = vadd.f32 1.0, %v548_v4 }
 0x11b   :  { %v552_v9 = vpop.eup %551  ;;  %559 = vrcp.f32 %v439_v5  ;;  %v441_v10 = vadd.f32 1.0, %v550_v7 }
 0x11c   :  { %v554_v11 = vpop.eup %553  ;;  %561 = vrcp.f32 %v440_v8  ;;  %v442_v12 = vadd.f32 1.0, %v552_v9 }
 0x11d   :  { %563 = vrcp.f32 %v441_v10  ;;  %v443_v13 = vadd.f32 1.0, %v554_v11 }
 0x11e   :  { %565 = vrcp.f32 %v442_v12 }
 0x11f   :  { %567 = vrcp.f32 %v443_v13 }
 0x123   :  { %v556_v14 = vpop.eup %555 }
 0x124   :  { %v558_v15 = vpop.eup %557 }
 0x125   :  { %v560_v16 = vpop.eup %559  ;;  %v458_v17 = vcombine.low %v556_v14, %v558_v15 }
 0x126   :  { %v562_v18 = vpop.eup %561 }
 0x127   :  { %v564_v19 = vpop.eup %563  ;;  %v459_v20 = vcombine.low %v560_v16, %v562_v18  ;;  %v466_v23 = vrot.slane %v458_v17, %v691_v6 }
 0x128   :  { %v566_v21 = vpop.eup %565 }
 0x129   :  { %v568_v22 = vpop.eup %567  ;;  %v473_v24 = vrot.slane %v459_v20, %v691_v6  ;;  %v475_v25 = vcombine.low %v564_v19, %v566_v21 }
 0x12a   :  { %v489_v26 = vrot.slane %v568_v22, %v691_v6 }
 0x12b   :  { %v474_v27 = vcombine.low %v466_v23, %v473_v24  ;;  %v482_v28 = vrot.slane %v475_v25, %v691_v6 }
 0x12d   :  { %v490_v29 = vcombine.low %v482_v28, %v489_v26  ;;  %493 = vst [vmem:[#allocation7] sm:$0xff] %v474_v27 }
 0x12f   :  { %498 = vst.msk [vmem:[#allocation7 + $0x8] sm:$0x3f] %vm497_vm6, %v490_v29 }
 0x130   :  { %624 = shalt.err (!%p621_p6)
}
 0x131   :  { %s625_s13 = scalar_lea.hbm %s731_s3, 224 }
 0x132   :  { %p626_p7 = scmp.ne.s32.totalorder %s731_s3, %s625_s13  ;;  %p629_p8 = scmp.lt.u32.totalorder %s625_s13, %s731_s3 }
 0x134   :  { %p631_p9 = pnand %p629_p8, %p626_p7 }
 0x136   :  { %634 = shalt.err (!%p631_p9)
}
 0x137   :  { %508 = dma.vmem_to_hbm [thread:$0]  %s506_s9, 224, %s731_s3, [#allocation4]  }
 0x138   :  { %639 = dma.done.wait [#allocation4], 224  }
 0x139   :  { %640 = vsyncadd [#allocation4], 4294967072 }
 0x13a   :  { %512 = vsyncpa [#allocation3], 1 }
 0x13b   :  { %513 = vsyncpa [#allocation6], 1 }
 0x13c   :  { %514 = vsyncpa [#allocation4], 1 }

</bundles_post_ra>
